<compile_context>
chip_gen: v7x
topology: tpu7x:2x2x1
jax: 0.10.0
libtpu: 0.0.40
codegen_flags: <defaults>
</compile_context>

<pallas_src>
import functools

import jax
import jax.numpy as jnp
from jax.experimental import pallas as pl
from jax.experimental.pallas import tpu as pltpu


def _fused_pointwise_stack_kernel(*refs, n_layers, relu_flags, compute_dtype):
    """refs = (x_ref, w_0, b_0, ..., w_{L-1}, b_{L-1}, o_ref).

    x_ref: (1, Cin, tm)        input tile (channels on sublanes, spatial on lanes)
    w_i:   (Cout_i, Cin_i)     resident weights (compute_dtype)
    b_i:   (Cout_i, 1)         resident biases (f32, added to the f32 accumulator)
    o_ref: (1, Cout, tm)       lane-dense output tile
    """
    x_ref = refs[0]
    o_ref = refs[-1]

    h = x_ref[0].astype(compute_dtype)  # (Cin, tm) -> bf16 for the MXU, no HBM cost
    for li in range(n_layers):
        w_ref = refs[1 + 2 * li]
        b_ref = refs[2 + 2 * li]
        y = jnp.dot(w_ref[...], h, preferred_element_type=jnp.float32)  # (Cout_i, tm)
        y = y + b_ref[...]                                              # lane-broadcast bias
        if relu_flags[li]:
            y = jnp.maximum(y, 0.0)
        if li + 1 < n_layers:
            h = y.astype(compute_dtype)       # stays in vregs/VMEM, never written to HBM
        else:
            o_ref[0] = y.astype(o_ref.dtype)  # unmasked, lane-dense store (last dim = tm)


def _choose_tile(cin, hidden_widths, cout, target_tm=2048,
                 act_vmem_budget=24 * 1024 * 1024):
    """Pick the spatial tile (lane) size from an activation VMEM budget."""
    bytes_per_col = (
        2 * cin * 4          # double-buffered f32 input tile
        + 2 * cout * 4       # double-buffered f32 output tile
        + cin * 2            # in-kernel bf16 copy of the input tile
        + sum(w * (4 + 2) for w in hidden_widths)  # f32 accumulator + bf16 intermediate
    )
    tm = (act_vmem_budget // max(bytes_per_col, 1)) // 128 * 128
    return int(max(128, min(target_tm, tm)))


def classifier_fcn3d_forward(x, params, relu_flags, *,
                             compute_dtype=jnp.bfloat16, target_tm=2048):
    """Forward pass of ClassifierFCN3D.

    x:          (N, Cin, D, H, W) float32
    params:     list of (w: (Cout_i, Cin_i) f32, b: (Cout_i, 1) f32)  (PyTorch conv
                weight (Cout, Cin, 1, 1, 1) squeezed; no transpose needed since y = W @ x)
    relu_flags: per-layer bool; False only for the final classifier conv.
    """
    n, cin, d, hh, ww = x.shape
    s = d * hh * ww
    x_flat = x.reshape(n, cin, s)  # free reshape, no transpose / HBM copy

    widths = [w.shape[0] for w, _ in params]
    cout = widths[-1]
    n_layers = len(params)

    tm = _choose_tile(cin, widths[:-1], cout, target_tm=target_tm)
    s_pad = pl.cdiv(s, tm) * tm
    if s_pad != s:
        # Padded columns produce relu(b)-style garbage; they are sliced off below.
        x_flat = jnp.pad(x_flat, ((0, 0), (0, 0), (0, s_pad - s)))

    # Weights in bf16 (tiny, resident); biases stay f32 (added to the f32 accumulator).
    flat_params = []
    for w, b in params:
        flat_params.append(w.astype(compute_dtype))
        flat_params.append(b.astype(jnp.float32))

    kernel = functools.partial(
        _fused_pointwise_stack_kernel,
        n_layers=n_layers,
        relu_flags=tuple(bool(f) for f in relu_flags),
        compute_dtype=compute_dtype,
    )

    in_specs = [pl.BlockSpec((1, cin, tm), lambda ni, si: (ni, 0, si))]
    for w, b in params:
        co, ci = w.shape
        in_specs.append(pl.BlockSpec((co, ci), lambda ni, si: (0, 0)))  # resident weights
        in_specs.append(pl.BlockSpec((co, 1), lambda ni, si: (0, 0)))   # resident bias
    out_spec = pl.BlockSpec((1, cout, tm), lambda ni, si: (ni, 0, si))

    grid = (n, s_pad // tm)

    # Explicit VMEM limit with headroom, capped to be safe on v7x (64 MiB physical).
    weight_bytes = sum(int(p.size) * p.dtype.itemsize for p in flat_params)
    act_bytes = tm * (2 * cin * 4 + 2 * cout * 4 + cin * 2
                      + sum(wd * 6 for wd in widths[:-1]))
    vmem_limit = int(min(max(weight_bytes + act_bytes + (4 << 20), 16 << 20), 48 << 20))

    y_flat = pl.pallas_call(
        kernel,
        out_shape=jax.ShapeDtypeStruct((n, cout, s_pad), jnp.float32),
        grid_spec=pltpu.PrefetchScalarGridSpec(
            num_scalar_prefetch=0,
            grid=grid,
            in_specs=in_specs,
            out_specs=out_spec,
        ),
        compiler_params=pltpu.CompilerParams(
            dimension_semantics=("parallel", "parallel"),  # v7x: shard across both TCs
            vmem_limit_bytes=vmem_limit,
        ),
    )(x_flat, *flat_params)

    y_flat = y_flat[:, :, :s]
    return y_flat.reshape(n, cout, d, hh, ww)


def init_classifier_fcn3d_params(key, in_ch, num_classes, layers_description):
    """Deterministic init mirroring the nn.Conv3d shapes of ClassifierFCN3D."""
    params = []
    relu_flags = []
    last = in_ch
    sizes = list(layers_description)
    for out_ch in sizes:
        key, kw, kb = jax.random.split(key, 3)
        bound = 1.0 / float(last) ** 0.5
        # PyTorch weight (out_ch, in_ch, 1, 1, 1) -> (out_ch, in_ch)
        w = jax.random.uniform(kw, (out_ch, last), jnp.float32, -bound, bound)
        b = jax.random.uniform(kb, (out_ch, 1), jnp.float32, -bound, bound)
        params.append((w, b))
        relu_flags.append(True)   # hidden layer: Conv3d + ReLU (+ Dropout, identity in eval)
        last = out_ch
    if num_classes is not None:
        key, kw, kb = jax.random.split(key, 3)
        bound = 1.0 / float(last) ** 0.5
        w = jax.random.uniform(kw, (num_classes, last), jnp.float32, -bound, bound)
        b = jax.random.uniform(kb, (num_classes, 1), jnp.float32, -bound, bound)
        params.append((w, b))
        relu_flags.append(False)  # final classifier conv: no ReLU
    return params, relu_flags


if __name__ == "__main__":
    # Small shapes consistent with the module: batch=2, in_ch=4, 3-D spatial 8x16x16,
    # layers_description=(32,), num_classes=8, dropout_rate=0.1 (eval -> identity).
    key = jax.random.PRNGKey(0)
    k_x, k_p = jax.random.split(key)

    in_ch, num_classes, layers_description = 4, 8, (32,)
    x = jax.random.normal(k_x, (2, in_ch, 8, 16, 16), jnp.float32)

    params, relu_flags = init_classifier_fcn3d_params(
        k_p, in_ch, num_classes, layers_description
    )

    out = classifier_fcn3d_forward(x, params, relu_flags)
    out = jax.block_until_ready(out)

    # Reference in plain JAX, matching the kernel's bf16-input / f32-accumulate numerics
    # (bf16 x bf16 products are exact in f32, so this tracks the MXU path closely).
    def ref_forward(x_nc):
        bf = lambda a: a.astype(jnp.bfloat16).astype(jnp.float32)
        h = bf(x_nc)
        for (w, b), rf in zip(params, relu_flags):
            y = jnp.einsum("ncdhw,oc->nodhw", h, bf(w)) + b[:, 0][None, :, None, None, None]
            if rf:
                y = jnp.maximum(y, 0.0)
            h = bf(y)
        return y

    ref = ref_forward(x)
    assert out.shape == (2, num_classes, 8, 16, 16), out.shape
    err = float(jnp.max(jnp.abs(out - ref)))
    assert jnp.allclose(out, ref, atol=1e-3, rtol=1e-3), err

    print("KERNEL_OK")
</pallas_src>

<mosaic_0001>
module attributes {stable_mosaic.version = 11 : i64} {
  func.func @_fused_pointwise_stack_kernel(%arg0: i32, %arg1: i32, %arg2: memref<1x4x2048xf32, #tpu.memory_space<vmem>>, %arg3: memref<32x4xbf16, #tpu.memory_space<vmem>>, %arg4: memref<32x1xf32, #tpu.memory_space<vmem>>, %arg5: memref<8x32xbf16, #tpu.memory_space<vmem>>, %arg6: memref<8x1xf32, #tpu.memory_space<vmem>>, %arg7: memref<1x8x2048xf32, #tpu.memory_space<vmem>>) attributes {dimension_semantics = [#tpu.dimension_semantics<parallel>, #tpu.dimension_semantics<parallel>], iteration_bounds = array<i64: 2, 1>, scalar_prefetch = 0 : i64, scratch_operands = 0 : i64, tpu.core_type = #tpu.core_type<tc>, window_params = [{transform_indices = @transform_0, window_bounds = array<i64: 1, 4, 2048>}, {pipeline_mode = #tpu.pipeline_mode<synchronous>, transform_indices = @transform_1, window_bounds = array<i64: 32, 4>}, {pipeline_mode = #tpu.pipeline_mode<synchronous>, transform_indices = @transform_2, window_bounds = array<i64: 32, 1>}, {pipeline_mode = #tpu.pipeline_mode<synchronous>, transform_indices = @transform_3, window_bounds = array<i64: 8, 32>}, {pipeline_mode = #tpu.pipeline_mode<synchronous>, transform_indices = @transform_4, window_bounds = array<i64: 8, 1>}, {transform_indices = @transform_5, window_bounds = array<i64: 1, 8, 2048>}]} {
    %c0 = arith.constant 0 : index
    %c0_0 = arith.constant 0 : index
    %c0_1 = arith.constant 0 : index
    %0 = vector.load %arg2[%c0, %c0_0, %c0_1] : memref<1x4x2048xf32, #tpu.memory_space<vmem>>, vector<1x4x2048xf32>
    %1 = vector.shape_cast %0 : vector<1x4x2048xf32> to vector<4x2048xf32>
    %2 = arith.truncf %1 : vector<4x2048xf32> to vector<4x2048xbf16>
    %c0_2 = arith.constant 0 : index
    %c0_3 = arith.constant 0 : index
    %3 = vector.load %arg3[%c0_2, %c0_3] : memref<32x4xbf16, #tpu.memory_space<vmem>>, vector<32x4xbf16>
    %cst = arith.constant dense<0.000000e+00> : vector<32x2048xf32>
    %4 = tpu.matmul %3, %2, %cst {dimension_numbers = #tpu.dot_dimension_numbers<[1], [0], [0], [1], [0, 0, 1, 1], [], []>} : vector<32x4xbf16>, vector<4x2048xbf16>, vector<32x2048xf32> -> vector<32x2048xf32>
    %c0_4 = arith.constant 0 : index
    %c0_5 = arith.constant 0 : index
    %5 = vector.load %arg4[%c0_4, %c0_5] : memref<32x1xf32, #tpu.memory_space<vmem>>, vector<32x1xf32>
    %6 = vector.broadcast %5 : vector<32x1xf32> to vector<32x2048xf32>
    %7 = arith.addf %4, %6 : vector<32x2048xf32>
    %cst_6 = arith.constant 0.000000e+00 : f32
    %8 = vector.broadcast %cst_6 : f32 to vector<32x2048xf32>
    %9 = arith.maximumf %7, %8 : vector<32x2048xf32>
    %10 = arith.truncf %9 : vector<32x2048xf32> to vector<32x2048xbf16>
    %c0_7 = arith.constant 0 : index
    %c0_8 = arith.constant 0 : index
    %11 = vector.load %arg5[%c0_7, %c0_8] : memref<8x32xbf16, #tpu.memory_space<vmem>>, vector<8x32xbf16>
    %cst_9 = arith.constant dense<0.000000e+00> : vector<8x2048xf32>
    %12 = tpu.matmul %11, %10, %cst_9 {dimension_numbers = #tpu.dot_dimension_numbers<[1], [0], [0], [1], [0, 0, 1, 1], [], []>} : vector<8x32xbf16>, vector<32x2048xbf16>, vector<8x2048xf32> -> vector<8x2048xf32>
    %c0_10 = arith.constant 0 : index
    %c0_11 = arith.constant 0 : index
    %13 = vector.load %arg6[%c0_10, %c0_11] : memref<8x1xf32, #tpu.memory_space<vmem>>, vector<8x1xf32>
    %14 = vector.broadcast %13 : vector<8x1xf32> to vector<8x2048xf32>
    %15 = arith.addf %12, %14 : vector<8x2048xf32>
    %c0_12 = arith.constant 0 : index
    %c0_13 = arith.constant 0 : index
    %c0_14 = arith.constant 0 : index
    %16 = vector.load %arg7[%c0_12, %c0_13, %c0_14] : memref<1x8x2048xf32, #tpu.memory_space<vmem>>, vector<1x8x2048xf32>
    %17 = vector.shape_cast %16 : vector<1x8x2048xf32> to vector<8x2048xf32>
    %18 = vector.shape_cast %15 : vector<8x2048xf32> to vector<1x8x2048xf32>
    tpu.vector_store %arg7[%c0_12, %c0_13, %c0_14], %18 {strides = array<i32>} : memref<1x8x2048xf32, #tpu.memory_space<vmem>>, vector<1x8x2048xf32>,
    return
  }
  func.func @transform_0(%arg0: i32, %arg1: i32) -> (i32, i32, i32) {
    %c0_i32 = arith.constant 0 : i32
    %c0_i32_0 = arith.constant 0 : i32
    return %arg0, %c0_i32, %arg1 : i32, i32, i32
  }
  func.func @transform_1(%arg0: i32, %arg1: i32) -> (i32, i32) {
    %c0_i32 = arith.constant 0 : i32
    %c0_i32_0 = arith.constant 0 : i32
    %c0_i32_1 = arith.constant 0 : i32
    return %c0_i32, %c0_i32_0 : i32, i32
  }
  func.func @transform_2(%arg0: i32, %arg1: i32) -> (i32, i32) {
    %c0_i32 = arith.constant 0 : i32
    %c0_i32_0 = arith.constant 0 : i32
    %c0_i32_1 = arith.constant 0 : i32
    return %c0_i32, %c0_i32_0 : i32, i32
  }
  func.func @transform_3(%arg0: i32, %arg1: i32) -> (i32, i32) {
    %c0_i32 = arith.constant 0 : i32
    %c0_i32_0 = arith.constant 0 : i32
    %c0_i32_1 = arith.constant 0 : i32
    return %c0_i32, %c0_i32_0 : i32, i32
  }
  func.func @transform_4(%arg0: i32, %arg1: i32) -> (i32, i32) {
    %c0_i32 = arith.constant 0 : i32
    %c0_i32_0 = arith.constant 0 : i32
    %c0_i32_1 = arith.constant 0 : i32
    return %c0_i32, %c0_i32_0 : i32, i32
  }
  func.func @transform_5(%arg0: i32, %arg1: i32) -> (i32, i32, i32) {
    %c0_i32 = arith.constant 0 : i32
    %c0_i32_0 = arith.constant 0 : i32
    return %arg0, %c0_i32, %arg1 : i32, i32, i32
  }
}

</mosaic_0001>

<bundles_post_ra>
// kernel: tpu_custom_call.1
= control target key start
LH: loop header
LB: loop body
LE: loop exit
PB: predicated region body
PF: predicated region fallthrough
CT: control target
= control target key end

     0   :  { %10 = vsyncpa [#allocation3], 0  ;;  %s2037_s0 = inlined_call_operand.hbm [shape: f32[2,4,2048], index: 0, kind: input, shape index: {}]   ;;  %s2038_s1 = inlined_call_operand.vmem [shape: bf16[32,4], index: 1, kind: input, shape index: {}]   ;;  %s2039_s2 = inlined_call_operand.vmem [shape: f32[32,1], index: 2, kind: input, shape index: {}]   ;;  %s2040_s3 = inlined_call_operand.vmem [shape: bf16[8,32], index: 3, kind: input, shape index: {}]   ;;  %s2041_s4 = inlined_call_operand.vmem [shape: f32[8,1], index: 4, kind: input, shape index: {}]   ;;  %s2042_s5 = inlined_call_operand.hbm [shape: f32[2,8,2048], index: 5, kind: output, shape index: {}]  }
   0x1   :  { %12 = vsyncpa [#allocation3 + $0x1], 0 }
   0x2   :  { %13 = vsyncpa [#allocation4], 0 }
   0x3   :  { %15 = vsyncpa [#allocation4 + $0x1], 0  ;;  %s1653_s18 = smov 0   ;;  %s1655_s19 = smov 0  }
   0x4   :  { %s1657_s20 = smov 0   ;;  %s1659_s21 = smov 0  }
   0x5   :  { %s1661_s22 = smov 0   ;;  %s1663_s23 = smov 0  }
   0x6 LB: > { %s1380_s24 = sadd.s32 4294967295, %s1618_s23   ;;  %s1381_s25 = sadd.s32 4294967294, %s1618_s23   ;;  %s1618_s23 = sphi %s1663_s23, %s21_s23   ;;  %s1614_s22 = sphi %s1661_s22, %s2058_s22   ;;  %s1610_s21 = sphi %s1659_s21, %s2057_s21   ;;  %s1606_s20 = sphi %s1657_s20, %s2056_s20   ;;  %s1602_s19 = sphi %s1655_s19, %s2055_s19   ;;  %s1598_s18 = sphi %s1653_s18, %s2054_s18  }
   0x7   : > { %s33_s26 = sadd.s32 1, %s1614_s22  ;;  %s42_s27 = sadd.s32 1, %s1606_s20 }
   0x8   : > { %p35_p0 = scmp.ge.s32.totalorder %s33_s26, 2  ;;  %p49_p1 = scmp.ne.s32.totalorder %s1606_s20, %s1602_s19 }
   0x9   : > { %p50_p2 = scmp.eq.s32.totalorder %s1618_s23, 0  ;;  %p55_p3 = scmp.ne.s32.totalorder %s1602_s19, %s1598_s18 }
   0xa   : > { %s2060_s26 = smov (%p35_p0, %s33_s26), 0  ;;  %p56_p5 = scmp.eq.s32.totalorder %s1380_s24, 0 }
   0xb   : > { %p1694_p4 = por %p50_p2, %p49_p1  ;;  %s37_s29 = ssub.s32 %s1614_s22, %s2060_s26 }
   0xc   : > { %p165_p6 = scmp.eq.s32.totalorder %s1380_s24, 1  ;;  %p40_p7 = scmp.eq.s32.totalorder %s37_s29, 0 }
   0xd   : > { %p1700_p8 = por %p56_p5, %p55_p3  ;;  %p171_p10 = scmp.eq.s32.totalorder %s1381_s25, 1 }
   0xe   : > { %p1704_p9 = por %p165_p6, %p49_p1  ;;  %p1443_p13 = scmp.lt.s32.totalorder %s1618_s23, 2 }
   0xf   : > { %s1709_s7 = scalar_select %p40_p7, %s1606_s20, %s42_s27  }
  0x10   : > { %s2046_s6 = scalar_select %p1704_p9, 1, 0 }
  0x11   : > { %p1711_p11 = por %p171_p10, %p55_p3  ;;  %s203_s9 = sand.u32 1, %s1606_s20  }
  0x12   : > { %s1384_s10 = sshll.u32 %s203_s9, 6  ;;  %s1429_s11 = sshll.u32 %s1614_s22, 10 }
  0x13   : > { %s2047_s8 = scalar_select %p1711_p11, 1, 0 }
  0x14   : > { %s1722_s14 = scalar_lea.hbm %s2037_s0, %s1429_s11  ;;  %s207_s15 = scalar_lea.vmem [#allocation2], %s1384_s10 }
  0x15   : > { %s217_s16 = sshll.u32 %s207_s15, 4  ;;  %p1728_p0 = pnand %p1443_p13, %p1694_p4  ;;  %s1724_s16 = int_to_ptr.vmem [resolvable:$true] %s217_s16 }
  0x16   : > { %s204_s24 = scalar_lea.sflag [#allocation3], %s203_s9  ;;  %s1506_s25 = scalar_lea.hbm %s1722_s14, 1024 }
  0x17   : > { %p1507_p3 = scmp.ne.s32.totalorder %s1722_s14, %s1506_s25  ;;  %p1508_p5 = pneg %p1728_p0 }
  0x18   : > { %s1511_s28 = scalar_lea.hbm %s2037_s0, 2048  ;;  %p1512_p4 = scmp.lt.u32.totalorder %s1722_s14, %s2037_s0 }
  0x19   : > { %p1509_p6 = pnand %p1508_p5, %p1507_p3  ;;  %p1513_p10 = scmp.lt.u32.totalorder %s1511_s28, %s1506_s25 }
  0x1a   : > { %p1515_p12 = scmp.lt.u32.totalorder %s1506_s25, %s1722_s14 }
  0x1b   : > { %p1510_p7 = pneg %p1509_p6  ;;  %p1514_p13 = por %p1513_p10, %p1512_p4 }
  0x1d   : > { %p1516_p1 = por %p1515_p12, %p1514_p13 }
  0x1f   : > { %p1517_p2 = pnand %p1516_p1, %p1510_p7 }
  0x21   : > { %1520 = shalt.err (!%p1517_p2)
}
  0x22   : > { %s1521_s9 = scalar_lea.vmem %s1724_s16, 1024  ;;  %s1620_s12 = smov [#allocation2]  }
  0x23   : > { %p1522_p3 = scmp.ne.s32.totalorder %s1724_s16, %s1521_s9  ;;  %s1526_s13 = sshll.u32 %s1620_s12, 4  ;;  %s1527_s13 = int_to_ptr.vmem [resolvable:$false] %s1526_s13 }
  0x24   : > { %s1528_s15 = scalar_lea.vmem %s1527_s13, 2048  ;;  %p1529_p9 = scmp.lt.s32.totalorder %s1724_s16, %s1527_s13 }
  0x25   : > { %p1524_p6 = pnand %p1522_p3, %p1508_p5  ;;  %p1530_p4 = scmp.lt.s32.totalorder %s1528_s15, %s1521_s9 }
  0x27   : > { %p1525_p11 = pneg %p1524_p6  ;;  %p1531_p10 = por %p1530_p4, %p1529_p9 }
  0x29   : > { %p1532_p12 = pnand %p1531_p10, %p1525_p11 }
  0x2b   : > { %1535 = shalt.err (!%p1532_p12)
}
  0x2c   : > { %1438 = dma.hbm_to_vmem [thread:$0]  (!%p1728_p0), %s1722_s14, 1024, %s1724_s16, %s204_s24  }
  0x2d   : > { %p2049_p1 = scmp.lt.s32.totalorder %s1618_s23, 3  ;;  %p2050_p2 = scmp.ge.s32.totalorder %s1618_s23, 1 }
  0x2f   : > { %p223_p5 = pnand %p2050_p2, %p2049_p1 }
  0x30   : > { %s1764_s25 = sand.u32 (!%p223_p5), 1, %s1602_s19  }
  0x31   : > { %226 = sbr.rel (%p223_p5) target bundleno = 576 (0x240), region = 40  ;;  %s1388_s27 = sshll.u32 (!%p223_p5), %s1764_s25, 6 }
  0x32   : > { %s229_s29 = scalar_lea.sflag (!%p223_p5), [#allocation3], %s1764_s25  ;;  %s1768_s28 = scalar_lea.vmem (!%p223_p5), [#allocation2], %s1388_s27 }
  0x38   : > { %1589 = dma.done.wait (%p1700_p8), %s229_s29, 1024  }
  0x39   : > { %1591 = vsyncadd (%p1700_p8), %s229_s29, 4294966272  ;;  %v1621_v0 = vmov 0   ;;  %v262_v1 = vld [vmem:[%s1768_s28] sm:$0xff]  ;;  %vm355_vm0 = vcmask 1041408   ;;  %v263_v2 = vld [vmem:[%s1768_s28 + $0x8] sm:$0xff]  ;;  %vm348_vm1 = vcmask 31744  }
  0x3a   : > { %436 = vmatprep.mubr.bf16.mxu0 %v1621_v0  ;;  %489 = vmatprep.mubr.bf16.mxu1 %v1621_v0  ;;  %v278_v3 = vcombine.high %v262_v1, %v262_v1  ;;  %v279_v4 = vcombine.high %v263_v2, %v263_v2  ;;  %v294_v5 = vpack.c.bf16 %v262_v1, %v262_v1  ;;  %v264_v7 = vld [vmem:[%s1768_s28 + $0x10] sm:$0xff]  ;;  %v265_v9 = vld [vmem:[%s1768_s28 + $0x18] sm:$0xff]  ;;  %v266_v15 = vld [vmem:[%s1768_s28 + $0x20] sm:$0xff]  ;;  %vm931_vm2 = vcmask 261120   ;;  %s1389_s16 = sshll.u32 %s1764_s25, 7  ;;  %s1430_s24 = sshll.u32 %s1610_s21, 11 }
  0x3b   : > { %1494 = vset.pattern.permute.xlu0 %v1621_v0  ;;  %1495 = vset.pattern.permute.xlu1 %v1621_v0  ;;  %v296_v6 = vpack.c.bf16 %v263_v2, %v263_v2  ;;  %v280_v8 = vcombine.high %v264_v7, %v264_v7  ;;  %v298_v10 = vpack.c.bf16 %v264_v7, %v264_v7  ;;  %v267_v16 = vld [vmem:[%s1768_s28 + $0x28] sm:$0xff]  ;;  %v314_v20 = vld [vmem:[%s2039_s2] sm:$0xff]  ;;  %v316_v24 = vld [vmem:[%s2039_s2 + $0x10] sm:$0xff]  ;;  %s1965_s17 = scalar_lea.vmem [#allocation5], %s1389_s16  ;;  %s1984_s12 = scalar_lea.hbm %s2042_s5, %s1430_s24 }
  0x3c   : > { %v295_v11 = vpack.c.bf16 %v278_v3, %v278_v3  ;;  %v297_v12 = vpack.c.bf16 %v279_v4, %v279_v4  ;;  %v357_v13 = vsel %vm355_vm0, %v294_v5, 0  ;;  %v281_v18 = vcombine.high %v265_v9, %v265_v9  ;;  %v1794_v21 = vld [vmem:[%s2038_s1] sm:$0xff]   ;;  %320 = vperm.xlu0 %1494, %v314_v20   ;;  %330 = vperm.xlu1 %1495, %v316_v24   ;;  %v315_v30 = vld [vmem:[%s2039_s2 + $0x8] sm:$0xff]  ;;  %v317_v31 = vld [vmem:[%s2039_s2 + $0x18] sm:$0xff]  ;;  %s1296_s10 = sshll.u32 %s1965_s17, 4  ;;  %s1280_s21 = scalar_lea.sflag [#allocation4], %s1764_s25  ;;  %s1986_s10 = int_to_ptr.vmem [resolvable:$true] %s1296_s10 }
  0x3d   : > { %v363_v14 = vsel %vm355_vm0, %v296_v6, 0  ;;  %v299_v17 = vpack.c.bf16 %v280_v8, %v280_v8  ;;  %v300_v19 = vpack.c.bf16 %v265_v9, %v265_v9  ;;  %v282_v22 = vcombine.high %v266_v15, %v266_v15  ;;  %v1501_v32 = vld [vmem:[%s2038_s1 + $0x8] sm:$0xff]   ;;  %v925_v33 = vld [vmem:[%s2041_s4] sm:$0xff]  ;;  %v268_v34 = vld [vmem:[%s1768_s28 + $0x30] sm:$0xff]  ;;  %s1536_s13 = scalar_lea.vmem %s1986_s10, 2048  ;;  %p2051_p9 = scmp.ne.s32.totalorder %s2046_s6, 0 }
  0x3e   : > { %1392 = vmatprep.subr.msk.bf16.mxu0 %vm355_vm0, %v295_v11  ;;  %1395 = vmatprep.subr.msk.bf16.mxu1 %vm355_vm0, %v297_v12  ;;  %v283_v23 = vcombine.high %v267_v16, %v267_v16  ;;  %v301_v25 = vpack.c.bf16 %v281_v18, %v281_v18  ;;  %v369_v26 = vsel %vm355_vm0, %v298_v10, 0  ;;  %v269_v35 = vld [vmem:[%s1768_s28 + $0x38] sm:$0xff]  ;;  %v302_v36 = vpack.c.bf16 %v266_v15, %v266_v15  ;;  %p1537_p8 = scmp.ne.s32.totalorder %s1986_s10, %s1536_s13  ;;  %s1622_s15 = smov [#allocation5]  }
  0x3f   : > { %405 = vmatpush1.bf16.msra.mxu0 %v357_v13  ;;  %458 = vmatpush1.bf16.msra.mxu1 %v363_v14  ;;  %v375_v27 = vsel %vm355_vm0, %v300_v19, 0  ;;  %v303_v28 = vpack.c.bf16 %v282_v22, %v282_v22  ;;  %v304_v37 = vpack.c.bf16 %v267_v16, %v267_v16  ;;  %v284_v38 = vcombine.high %v268_v34, %v268_v34  ;;  %s1540_s27 = sshll.u32 %s1622_s15, 4  ;;  %s1541_s27 = int_to_ptr.vmem [resolvable:$false] %s1540_s27 }
  0x40   : > { %1398 = vmatprep.subr.msk.bf16.mxu0 %vm355_vm0, %v299_v17  ;;  %1401 = vmatprep.subr.msk.bf16.mxu1 %vm355_vm0, %v301_v25  ;;  %v305_v29 = vpack.c.bf16 %v283_v23, %v283_v23  ;;  %v285_v39 = vcombine.high %v269_v35, %v269_v35  ;;  %v381_v40 = vsel %vm355_vm0, %v302_v36, 0  ;;  %v306_v44 = vpack.c.bf16 %v268_v34, %v268_v34  ;;  %p1538_p11 = pnand %p1537_p8, %p2051_p9  ;;  %s1542_s29 = scalar_lea.vmem %s1541_s27, 4096 }
  0x41   : > { %325 = vperm.xlu0 %1494, %v315_v30   ;;  %335 = vperm.xlu1 %1495, %v317_v31   ;;  %v387_v41 = vsel %vm355_vm0, %v304_v37, 0  ;;  %v307_v42 = vpack.c.bf16 %v284_v38, %v284_v38  ;;  %v308_v45 = vpack.c.bf16 %v269_v35, %v269_v35  ;;  %p1543_p7 = scmp.lt.s32.totalorder %s1986_s10, %s1541_s27  ;;  %p1544_p13 = scmp.lt.s32.totalorder %s1542_s29, %s1536_s13 }
  0x42   : > { %1393 = vmatmul.mubr.msk.bf16.vlgmr.msra.gmra.mrb[0].mxu0 %vm348_vm1, %v1794_v21  ;;  %1396 = vmatmul.mubr.msk.bf16.vlgmr.msra.gmra.mrb[0].mxu1 %vm348_vm1, %v1794_v21  ;;  %v309_v43 = vpack.c.bf16 %v285_v39, %v285_v39  ;;  %v393_v46 = vsel %vm355_vm0, %v306_v44, 0  ;;  %p1539_p0 = pneg %p1538_p11 }
  0x43   : > { %511 = vmatpush1.bf16.msra.mxu0 %v369_v26  ;;  %564 = vmatpush1.bf16.msra.mxu1 %v375_v27  ;;  %v399_v47 = vsel %vm355_vm0, %v308_v45, 0  ;;  %p1545_p3 = por %p1544_p13, %p1543_p7 }
  0x44   : > { %446 = vmatprep.mubr.bf16.mxu0 %v1621_v0  ;;  %499 = vmatprep.mubr.bf16.mxu1 %v1621_v0 }
  0x45   : > { %1404 = vmatprep.subr.msk.bf16.mxu0 %vm355_vm0, %v303_v28  ;;  %1407 = vmatprep.subr.msk.bf16.mxu1 %vm355_vm0, %v305_v29  ;;  %p1546_p6 = pnand %p1545_p3, %p1539_p0 }
  0x46   : > { %928 = vperm.xlu0 %1494, %v925_v33  }
  0x4a   : > { %1394 = vmatmul.mubr.msk.bf16.gmra.mrb[4].mxu0 %vm348_vm1, %v1501_v32  ;;  %1397 = vmatmul.mubr.msk.bf16.gmra.mrb[4].mxu1 %vm348_vm1, %v1501_v32 }
  0x4b   : > { %542 = vmatprep.mubr.bf16.mxu0 %v1621_v0  ;;  %595 = vmatprep.mubr.bf16.mxu1 %v1621_v0 }
  0x52   : > { %1399 = vmatmul.mubr.msk.bf16.vlgmr.msra.gmra.mrb[8].mxu0 %vm348_vm1, %v1794_v21  ;;  %1402 = vmatmul.mubr.msk.bf16.vlgmr.msra.gmra.mrb[8].mxu1 %vm348_vm1, %v1794_v21 }
  0x53   : > { %617 = vmatpush1.bf16.msra.mxu0 %v381_v40  ;;  %670 = vmatpush1.bf16.msra.mxu1 %v387_v41 }
  0x54   : > { %552 = vmatprep.mubr.bf16.mxu0 %v1621_v0  ;;  %605 = vmatprep.mubr.bf16.mxu1 %v1621_v0 }
  0x55   : > { %1410 = vmatprep.subr.msk.bf16.mxu0 %vm355_vm0, %v307_v42  ;;  %1413 = vmatprep.subr.msk.bf16.mxu1 %vm355_vm0, %v309_v43 }
  0x5a   : > { %1400 = vmatmul.mubr.msk.bf16.gmra.mrb[12].mxu0 %vm348_vm1, %v1501_v32  ;;  %1403 = vmatmul.mubr.msk.bf16.gmra.mrb[12].mxu1 %vm348_vm1, %v1501_v32 }
  0x5b   : > { %648 = vmatprep.mubr.bf16.mxu0 %v1621_v0  ;;  %701 = vmatprep.mubr.bf16.mxu1 %v1621_v0 }
  0x62   : > { %1405 = vmatmul.mubr.msk.bf16.vlgmr.msra.gmra.mrb[16].mxu0 %vm348_vm1, %v1794_v21  ;;  %1408 = vmatmul.mubr.msk.bf16.vlgmr.msra.gmra.mrb[16].mxu1 %vm348_vm1, %v1794_v21 }
  0x63   : > { %723 = vmatpush1.bf16.msra.mxu0 %v393_v46  ;;  %776 = vmatpush1.bf16.msra.mxu1 %v399_v47 }
  0x64   : > { %658 = vmatprep.mubr.bf16.mxu0 %v1621_v0  ;;  %711 = vmatprep.mubr.bf16.mxu1 %v1621_v0 }
  0x6a   : > { %1406 = vmatmul.mubr.msk.bf16.gmra.mrb[20].mxu0 %vm348_vm1, %v1501_v32  ;;  %1409 = vmatmul.mubr.msk.bf16.gmra.mrb[20].mxu1 %vm348_vm1, %v1501_v32 }
  0x6b   : > { %754 = vmatprep.mubr.bf16.mxu0 %v1621_v0  ;;  %807 = vmatprep.mubr.bf16.mxu1 %v1621_v0 }
  0x72   : > { %1411 = vmatmul.mubr.msk.bf16.vlgmr.msra.gmra.mrb[24].mxu0 %vm348_vm1, %v1794_v21  ;;  %1414 = vmatmul.mubr.msk.bf16.vlgmr.msra.gmra.mrb[24].mxu1 %vm348_vm1, %v1794_v21 }
  0x73   : > { %764 = vmatprep.mubr.bf16.mxu0 %v1621_v0  ;;  %817 = vmatprep.mubr.bf16.mxu1 %v1621_v0 }
  0x7a   : > { %1412 = vmatmul.mubr.msk.bf16.gmra.mrb[28].mxu0 %vm348_vm1, %v1501_v32  ;;  %1415 = vmatmul.mubr.msk.bf16.gmra.mrb[28].mxu1 %vm348_vm1, %v1501_v32 }
  0x7b   : > { %967 = vmatprep.mubr.bf16.mxu0 %v1621_v0  ;;  %1008 = vmatprep.mubr.bf16.mxu1 %v1621_v0 }
  0xbb   : > { %v1865_v48 = vpop.permute.xlu0 %320  ;;  %v1869_v50 = vpop.permute.xlu1 %330 }
  0xc0   : > { %v1867_v49 = vpop.permute.xlu0 %325  ;;  %v1879_v14 = vpop.permute.xlu1 %335 }
 0x115   : > { %v438_v51 = vpop.f32.mrb[0].mxu0  ;;  %v491_v52 = vpop.f32.mrb[0].mxu1 }
 0x116   : > { %v439_v53 = vadd.f32 %v438_v51, %v1865_v48  ;;  %v492_v54 = vadd.f32 %v491_v52, %v1865_v48  ;;  %v440_v55 = vpop.f32.mrb[1].mxu0  ;;  %v493_v56 = vpop.f32.mrb[1].mxu1 }
 0x117   : > { %v441_v57 = vadd.f32 %v440_v55, %v1865_v48  ;;  %v494_v58 = vadd.f32 %v493_v56, %v1865_v48  ;;  %v442_v59 = vpop.f32.mrb[2].mxu0  ;;  %v495_v60 = vpop.f32.mrb[2].mxu1 }
 0x118   : > { %v443_v61 = vadd.f32 %v442_v59, %v1867_v49  ;;  %v496_v62 = vadd.f32 %v495_v60, %v1867_v49  ;;  %v444_v63 = vpop.f32.mrb[3].mxu0  ;;  %v497_v1 = vpop.f32.mrb[3].mxu1  ;;  %v828_v4 = vmax.f32 %v439_v53, 0.0  ;;  %v830_v5 = vmax.f32 %v492_v54, 0.0 }
 0x119   : > { %v445_v2 = vadd.f32 %v444_v63, %v1867_v49  ;;  %v498_v3 = vadd.f32 %v497_v1, %v1867_v49  ;;  %v829_v8 = vmax.f32 %v441_v57, 0.0  ;;  %v831_v9 = vmax.f32 %v494_v58, 0.0 }
 0x11a   : > { %v844_v6 = vmax.f32 %v443_v61, 0.0  ;;  %v846_v7 = vmax.f32 %v496_v62, 0.0  ;;  %v1898_v62 = vld [vmem:[%s2040_s3] sm:$0xf] }
 0x11b   : > { %v845_v10 = vmax.f32 %v445_v2, 0.0  ;;  %v847_v11 = vmax.f32 %v498_v3, 0.0 }
 0x11c   : > { %v892_v12 = vpack.c.bf16 %v844_v6, %v828_v4  ;;  %v894_v13 = vpack.c.bf16 %v846_v7, %v830_v5 }
 0x11d   : > { %v893_v15 = vpack.c.bf16 %v845_v10, %v829_v8  ;;  %v895_v16 = vpack.c.bf16 %v847_v11, %v831_v9  ;;  %v448_v17 = vpop.f32.mrb[4].mxu0  ;;  %v501_v18 = vpop.f32.mrb[4].mxu1 }
 0x11e   : > { %v449_v19 = vadd.f32 %v448_v17, %v1869_v50  ;;  %v502_v20 = vadd.f32 %v501_v18, %v1869_v50  ;;  %v450_v21 = vpop.f32.mrb[5].mxu0  ;;  %v503_v22 = vpop.f32.mrb[5].mxu1 }
 0x11f   : > { %v451_v23 = vadd.f32 %v450_v21, %v1869_v50  ;;  %v504_v24 = vadd.f32 %v503_v22, %v1869_v50  ;;  %v452_v25 = vpop.f32.mrb[6].mxu0  ;;  %v505_v26 = vpop.f32.mrb[6].mxu1  ;;  %935 = vmatprep.subr.bf16.mxu0 %v893_v15  ;;  %976 = vmatprep.subr.bf16.mxu1 %v895_v16 }
 0x120   : > { %v453_v27 = vadd.f32 %v452_v25, %v1879_v14  ;;  %v506_v28 = vadd.f32 %v505_v26, %v1879_v14  ;;  %v454_v29 = vpop.f32.mrb[7].mxu0  ;;  %v507_v30 = vpop.f32.mrb[7].mxu1  ;;  %936 = vmatpush1.bf16.msra.mxu0 %v892_v12  ;;  %977 = vmatpush1.bf16.msra.mxu1 %v894_v13  ;;  %v860_v33 = vmax.f32 %v449_v19, 0.0  ;;  %v862_v34 = vmax.f32 %v502_v20, 0.0 }
 0x121   : > { %v455_v31 = vadd.f32 %v454_v29, %v1879_v14  ;;  %v508_v32 = vadd.f32 %v507_v30, %v1879_v14  ;;  %v861_v37 = vmax.f32 %v451_v23, 0.0  ;;  %v863_v38 = vmax.f32 %v504_v24, 0.0 }
 0x122   : > { %v876_v35 = vmax.f32 %v453_v27, 0.0  ;;  %v878_v36 = vmax.f32 %v506_v28, 0.0 }
 0x123   : > { %v877_v39 = vmax.f32 %v455_v31, 0.0  ;;  %v879_v40 = vmax.f32 %v508_v32, 0.0 }
 0x124   : > { %v908_v41 = vpack.c.bf16 %v876_v35, %v860_v33  ;;  %v910_v42 = vpack.c.bf16 %v878_v36, %v862_v34 }
 0x125   : > { %v909_v43 = vpack.c.bf16 %v877_v39, %v861_v37  ;;  %v911_v44 = vpack.c.bf16 %v879_v40, %v863_v38  ;;  %v544_v45 = vpop.f32.mrb[8].mxu0  ;;  %v597_v46 = vpop.f32.mrb[8].mxu1 }
 0x126   : > { %v545_v47 = vadd.f32 %v544_v45, %v1865_v48  ;;  %v598_v51 = vadd.f32 %v597_v46, %v1865_v48  ;;  %v546_v52 = vpop.f32.mrb[9].mxu0  ;;  %v599_v53 = vpop.f32.mrb[9].mxu1 }
 0x127   : > { %v547_v54 = vadd.f32 %v546_v52, %v1865_v48  ;;  %v600_v55 = vadd.f32 %v599_v53, %v1865_v48  ;;  %v548_v56 = vpop.f32.mrb[10].mxu0  ;;  %v601_v57 = vpop.f32.mrb[10].mxu1  ;;  %937 = vmatprep.subr.bf16.mxu0 %v909_v43  ;;  %978 = vmatprep.subr.bf16.mxu1 %v911_v44 }
 0x128   : > { %v549_v58 = vadd.f32 %v548_v56, %v1867_v49  ;;  %v602_v59 = vadd.f32 %v601_v57, %v1867_v49  ;;  %v550_v60 = vpop.f32.mrb[11].mxu0  ;;  %v603_v61 = vpop.f32.mrb[11].mxu1  ;;  %938 = vmatpush1.bf16.msra.mxu0 %v908_v41  ;;  %979 = vmatpush1.bf16.msra.mxu1 %v910_v42  ;;  %v832_v2 = vmax.f32 %v545_v47, 0.0  ;;  %v834_v3 = vmax.f32 %v598_v51, 0.0 }
 0x129   : > { %v551_v63 = vadd.f32 %v550_v60, %v1867_v49  ;;  %v604_v1 = vadd.f32 %v603_v61, %v1867_v49  ;;  %v833_v6 = vmax.f32 %v547_v54, 0.0  ;;  %v835_v7 = vmax.f32 %v600_v55, 0.0 }
 0x12a   : > { %v848_v4 = vmax.f32 %v549_v58, 0.0  ;;  %v850_v5 = vmax.f32 %v602_v59, 0.0 }
 0x12b   : > { %v849_v8 = vmax.f32 %v551_v63, 0.0  ;;  %v851_v9 = vmax.f32 %v604_v1, 0.0  ;;  %1416 = vmatmul.mubr.msk.bf16.vlgmr.msra.gmra.mrb[32].mxu0 %vm931_vm2, %v1898_v62  ;;  %1417 = vmatmul.mubr.msk.bf16.vlgmr.msra.gmra.mrb[32].mxu1 %vm931_vm2, %v1898_v62 }
 0x12c   : > { %v896_v10 = vpack.c.bf16 %v848_v4, %v832_v2  ;;  %v898_v11 = vpack.c.bf16 %v850_v5, %v834_v3  ;;  %1049 = vmatprep.mubr.bf16.mxu0 %v1621_v0  ;;  %1090 = vmatprep.mubr.bf16.mxu1 %v1621_v0 }
 0x12d   : > { %v897_v12 = vpack.c.bf16 %v849_v8, %v833_v6  ;;  %v899_v13 = vpack.c.bf16 %v851_v9, %v835_v7  ;;  %v554_v15 = vpop.f32.mrb[12].mxu0  ;;  %v607_v16 = vpop.f32.mrb[12].mxu1 }
 0x12e   : > { %v555_v17 = vadd.f32 %v554_v15, %v1869_v50  ;;  %v608_v18 = vadd.f32 %v607_v16, %v1869_v50  ;;  %v556_v19 = vpop.f32.mrb[13].mxu0  ;;  %v609_v20 = vpop.f32.mrb[13].mxu1 }
 0x12f   : > { %v557_v21 = vadd.f32 %v556_v19, %v1869_v50  ;;  %v610_v22 = vadd.f32 %v609_v20, %v1869_v50  ;;  %v558_v23 = vpop.f32.mrb[14].mxu0  ;;  %v611_v24 = vpop.f32.mrb[14].mxu1  ;;  %1017 = vmatprep.subr.bf16.mxu0 %v897_v12  ;;  %1058 = vmatprep.subr.bf16.mxu1 %v899_v13 }
 0x130   : > { %v559_v25 = vadd.f32 %v558_v23, %v1879_v14  ;;  %v612_v26 = vadd.f32 %v611_v24, %v1879_v14  ;;  %v560_v27 = vpop.f32.mrb[15].mxu0  ;;  %v613_v28 = vpop.f32.mrb[15].mxu1  ;;  %1018 = vmatpush1.bf16.msra.mxu0 %v896_v10  ;;  %1059 = vmatpush1.bf16.msra.mxu1 %v898_v11  ;;  %v864_v31 = vmax.f32 %v555_v17, 0.0  ;;  %v866_v32 = vmax.f32 %v608_v18, 0.0 }
 0x131   : > { %v561_v29 = vadd.f32 %v560_v27, %v1879_v14  ;;  %v614_v30 = vadd.f32 %v613_v28, %v1879_v14  ;;  %v865_v35 = vmax.f32 %v557_v21, 0.0  ;;  %v867_v36 = vmax.f32 %v610_v22, 0.0 }
 0x132   : > { %v880_v33 = vmax.f32 %v559_v25, 0.0  ;;  %v882_v34 = vmax.f32 %v612_v26, 0.0 }
 0x133   : > { %v881_v37 = vmax.f32 %v561_v29, 0.0  ;;  %v883_v38 = vmax.f32 %v614_v30, 0.0 }
 0x134   : > { %v912_v39 = vpack.c.bf16 %v880_v33, %v864_v31  ;;  %v914_v40 = vpack.c.bf16 %v882_v34, %v866_v32 }
 0x135   : > { %v913_v41 = vpack.c.bf16 %v881_v37, %v865_v35  ;;  %v915_v42 = vpack.c.bf16 %v883_v38, %v867_v36  ;;  %v650_v43 = vpop.f32.mrb[16].mxu0  ;;  %v703_v44 = vpop.f32.mrb[16].mxu1 }
 0x136   : > { %v651_v45 = vadd.f32 %v650_v43, %v1865_v48  ;;  %v704_v46 = vadd.f32 %v703_v44, %v1865_v48  ;;  %v652_v47 = vpop.f32.mrb[17].mxu0  ;;  %v705_v51 = vpop.f32.mrb[17].mxu1 }
 0x137   : > { %v653_v52 = vadd.f32 %v652_v47, %v1865_v48  ;;  %v706_v53 = vadd.f32 %v705_v51, %v1865_v48  ;;  %v654_v54 = vpop.f32.mrb[18].mxu0  ;;  %v707_v55 = vpop.f32.mrb[18].mxu1  ;;  %1019 = vmatprep.subr.bf16.mxu0 %v913_v41  ;;  %1060 = vmatprep.subr.bf16.mxu1 %v915_v42 }
 0x138   : > { %v655_v56 = vadd.f32 %v654_v54, %v1867_v49  ;;  %v708_v57 = vadd.f32 %v707_v55, %v1867_v49  ;;  %v656_v58 = vpop.f32.mrb[19].mxu0  ;;  %v709_v59 = vpop.f32.mrb[19].mxu1  ;;  %1020 = vmatpush1.bf16.msra.mxu0 %v912_v39  ;;  %1061 = vmatpush1.bf16.msra.mxu1 %v914_v40  ;;  %v836_v63 = vmax.f32 %v651_v45, 0.0  ;;  %v838_v1 = vmax.f32 %v704_v46, 0.0 }
 0x139   : > { %v657_v60 = vadd.f32 %v656_v58, %v1867_v49  ;;  %v710_v61 = vadd.f32 %v709_v59, %v1867_v49  ;;  %v837_v4 = vmax.f32 %v653_v52, 0.0  ;;  %v839_v5 = vmax.f32 %v706_v53, 0.0 }
 0x13a   : > { %v852_v2 = vmax.f32 %v655_v56, 0.0  ;;  %v854_v3 = vmax.f32 %v708_v57, 0.0 }
 0x13b   : > { %v853_v6 = vmax.f32 %v657_v60, 0.0  ;;  %v855_v7 = vmax.f32 %v710_v61, 0.0  ;;  %1418 = vmatmul.mubr.msk.bf16.vlgmr.msra.gmra.mrb[36].mxu0 %vm931_vm2, %v1898_v62  ;;  %1419 = vmatmul.mubr.msk.bf16.vlgmr.msra.gmra.mrb[36].mxu1 %vm931_vm2, %v1898_v62 }
 0x13c   : > { %v900_v8 = vpack.c.bf16 %v852_v2, %v836_v63  ;;  %v902_v9 = vpack.c.bf16 %v854_v3, %v838_v1  ;;  %1131 = vmatprep.mubr.bf16.mxu0 %v1621_v0  ;;  %1172 = vmatprep.mubr.bf16.mxu1 %v1621_v0 }
 0x13d   : > { %v901_v10 = vpack.c.bf16 %v853_v6, %v837_v4  ;;  %v903_v11 = vpack.c.bf16 %v855_v7, %v839_v5  ;;  %v660_v12 = vpop.f32.mrb[20].mxu0  ;;  %v713_v13 = vpop.f32.mrb[20].mxu1 }
 0x13e   : > { %v661_v15 = vadd.f32 %v660_v12, %v1869_v50  ;;  %v714_v16 = vadd.f32 %v713_v13, %v1869_v50  ;;  %v662_v17 = vpop.f32.mrb[21].mxu0  ;;  %v715_v18 = vpop.f32.mrb[21].mxu1 }
 0x13f   : > { %v663_v19 = vadd.f32 %v662_v17, %v1869_v50  ;;  %v716_v20 = vadd.f32 %v715_v18, %v1869_v50  ;;  %v664_v21 = vpop.f32.mrb[22].mxu0  ;;  %v717_v22 = vpop.f32.mrb[22].mxu1  ;;  %1099 = vmatprep.subr.bf16.mxu0 %v901_v10  ;;  %1140 = vmatprep.subr.bf16.mxu1 %v903_v11 }
 0x140   : > { %v665_v23 = vadd.f32 %v664_v21, %v1879_v14  ;;  %v718_v24 = vadd.f32 %v717_v22, %v1879_v14  ;;  %v666_v25 = vpop.f32.mrb[23].mxu0  ;;  %v719_v26 = vpop.f32.mrb[23].mxu1  ;;  %1100 = vmatpush1.bf16.msra.mxu0 %v900_v8  ;;  %1141 = vmatpush1.bf16.msra.mxu1 %v902_v9  ;;  %v868_v29 = vmax.f32 %v661_v15, 0.0  ;;  %v870_v30 = vmax.f32 %v714_v16, 0.0 }
 0x141   : > { %v667_v27 = vadd.f32 %v666_v25, %v1879_v14  ;;  %v720_v28 = vadd.f32 %v719_v26, %v1879_v14  ;;  %v869_v33 = vmax.f32 %v663_v19, 0.0  ;;  %v871_v34 = vmax.f32 %v716_v20, 0.0 }
 0x142   : > { %v884_v31 = vmax.f32 %v665_v23, 0.0  ;;  %v886_v32 = vmax.f32 %v718_v24, 0.0 }
 0x143   : > { %v885_v35 = vmax.f32 %v667_v27, 0.0  ;;  %v887_v36 = vmax.f32 %v720_v28, 0.0 }
 0x144   : > { %v916_v37 = vpack.c.bf16 %v884_v31, %v868_v29  ;;  %v918_v38 = vpack.c.bf16 %v886_v32, %v870_v30 }
 0x145   : > { %v917_v39 = vpack.c.bf16 %v885_v35, %v869_v33  ;;  %v919_v40 = vpack.c.bf16 %v887_v36, %v871_v34  ;;  %v756_v41 = vpop.f32.mrb[24].mxu0  ;;  %v809_v42 = vpop.f32.mrb[24].mxu1 }
 0x146   : > { %v757_v43 = vadd.f32 %v756_v41, %v1865_v48  ;;  %v810_v44 = vadd.f32 %v809_v42, %v1865_v48  ;;  %v758_v45 = vpop.f32.mrb[25].mxu0  ;;  %v811_v46 = vpop.f32.mrb[25].mxu1 }
 0x147   : > { %v759_v47 = vadd.f32 %v758_v45, %v1865_v48  ;;  %v812_v51 = vadd.f32 %v811_v46, %v1865_v48  ;;  %v760_v52 = vpop.f32.mrb[26].mxu0  ;;  %v813_v53 = vpop.f32.mrb[26].mxu1  ;;  %1101 = vmatprep.subr.bf16.mxu0 %v917_v39  ;;  %1142 = vmatprep.subr.bf16.mxu1 %v919_v40 }
 0x148   : > { %v761_v54 = vadd.f32 %v760_v52, %v1867_v49  ;;  %v814_v55 = vadd.f32 %v813_v53, %v1867_v49  ;;  %v762_v56 = vpop.f32.mrb[27].mxu0  ;;  %v815_v57 = vpop.f32.mrb[27].mxu1  ;;  %1102 = vmatpush1.bf16.msra.mxu0 %v916_v37  ;;  %1143 = vmatpush1.bf16.msra.mxu1 %v918_v38  ;;  %v840_v60 = vmax.f32 %v757_v43, 0.0  ;;  %v842_v61 = vmax.f32 %v810_v44, 0.0 }
 0x149   : > { %v763_v58 = vadd.f32 %v762_v56, %v1867_v49  ;;  %v816_v59 = vadd.f32 %v815_v57, %v1867_v49  ;;  %v841_v1 = vmax.f32 %v759_v47, 0.0  ;;  %v843_v2 = vmax.f32 %v812_v51, 0.0 }
 0x14a   : > { %v856_v63 = vmax.f32 %v761_v54, 0.0  ;;  %v858_v48 = vmax.f32 %v814_v55, 0.0 }
 0x14b   : > { %v857_v3 = vmax.f32 %v763_v58, 0.0  ;;  %v859_v4 = vmax.f32 %v816_v59, 0.0  ;;  %1420 = vmatmul.mubr.msk.bf16.vlgmr.msra.gmra.mrb[40].mxu0 %vm931_vm2, %v1898_v62  ;;  %1421 = vmatmul.mubr.msk.bf16.vlgmr.msra.gmra.mrb[40].mxu1 %vm931_vm2, %v1898_v62 }
 0x14c   : > { %v904_v5 = vpack.c.bf16 %v856_v63, %v840_v60  ;;  %v906_v6 = vpack.c.bf16 %v858_v48, %v842_v61  ;;  %1213 = vmatprep.mubr.bf16.mxu0 %v1621_v0  ;;  %1254 = vmatprep.mubr.bf16.mxu1 %v1621_v0 }
 0x14d   : > { %v905_v49 = vpack.c.bf16 %v857_v3, %v841_v1  ;;  %v907_v7 = vpack.c.bf16 %v859_v4, %v843_v2  ;;  %v766_v8 = vpop.f32.mrb[28].mxu0  ;;  %v819_v9 = vpop.f32.mrb[28].mxu1 }
 0x14e   : > { %v767_v10 = vadd.f32 %v766_v8, %v1869_v50  ;;  %v820_v11 = vadd.f32 %v819_v9, %v1869_v50  ;;  %v768_v12 = vpop.f32.mrb[29].mxu0  ;;  %v821_v13 = vpop.f32.mrb[29].mxu1 }
 0x14f   : > { %v769_v15 = vadd.f32 %v768_v12, %v1869_v50  ;;  %v822_v16 = vadd.f32 %v821_v13, %v1869_v50  ;;  %v770_v17 = vpop.f32.mrb[30].mxu0  ;;  %v823_v18 = vpop.f32.mrb[30].mxu1  ;;  %1181 = vmatprep.subr.bf16.mxu0 %v905_v49  ;;  %1222 = vmatprep.subr.bf16.mxu1 %v907_v7 }
 0x150   : > { %v771_v0 = vadd.f32 %v770_v17, %v1879_v14  ;;  %v824_v19 = vadd.f32 %v823_v18, %v1879_v14  ;;  %v772_v20 = vpop.f32.mrb[31].mxu0  ;;  %v825_v21 = vpop.f32.mrb[31].mxu1  ;;  %1182 = vmatpush1.bf16.msra.mxu0 %v904_v5  ;;  %1223 = vmatpush1.bf16.msra.mxu1 %v906_v6  ;;  %v872_v24 = vmax.f32 %v767_v10, 0.0  ;;  %v874_v25 = vmax.f32 %v820_v11, 0.0 }
 0x151   : > { %v773_v22 = vadd.f32 %v772_v20, %v1879_v14  ;;  %v826_v23 = vadd.f32 %v825_v21, %v1879_v14  ;;  %v873_v27 = vmax.f32 %v769_v15, 0.0  ;;  %v875_v28 = vmax.f32 %v822_v16, 0.0  ;;  %v929_v14 = vpop.permute.xlu0 %928 }
 0x152   : > { %v888_v26 = vmax.f32 %v771_v0, 0.0  ;;  %v890_v50 = vmax.f32 %v824_v19, 0.0 }
 0x153   : > { %v889_v29 = vmax.f32 %v773_v22, 0.0  ;;  %v891_v30 = vmax.f32 %v826_v23, 0.0 }
 0x154   : > { %v920_v31 = vpack.c.bf16 %v888_v26, %v872_v24  ;;  %v922_v32 = vpack.c.bf16 %v890_v50, %v874_v25 }
 0x155   : > { %v921_v33 = vpack.c.bf16 %v889_v29, %v873_v27  ;;  %v923_v34 = vpack.c.bf16 %v891_v30, %v875_v28 }
 0x157   : > { %1183 = vmatprep.subr.bf16.mxu0 %v921_v33  ;;  %1224 = vmatprep.subr.bf16.mxu1 %v923_v34 }
 0x158   : > { %1184 = vmatpush1.bf16.msra.mxu0 %v920_v31  ;;  %1225 = vmatpush1.bf16.msra.mxu1 %v922_v32 }
 0x15b   : > { %1422 = vmatmul.mubr.msk.bf16.vlgmr.msra.gmra.mrb[44].mxu0 %vm931_vm2, %v1898_v62  ;;  %1423 = vmatmul.mubr.msk.bf16.vlgmr.msra.gmra.mrb[44].mxu1 %vm931_vm2, %v1898_v62 }
 0x1fe   : > { %v969_v35 = vpop.f32.mrb[32].mxu0  ;;  %v1010_v36 = vpop.f32.mrb[32].mxu1 }
 0x1ff   : > { %v970_v37 = vadd.f32 %v969_v35, %v929_v14  ;;  %v1011_v38 = vadd.f32 %v1010_v36, %v929_v14  ;;  %v971_v39 = vpop.f32.mrb[33].mxu0  ;;  %v1012_v40 = vpop.f32.mrb[33].mxu1 }
 0x200   : > { %v972_v41 = vadd.f32 %v971_v39, %v929_v14  ;;  %v1013_v42 = vadd.f32 %v1012_v40, %v929_v14  ;;  %v973_v43 = vpop.f32.mrb[34].mxu0  ;;  %v1014_v44 = vpop.f32.mrb[34].mxu1 }
 0x201   : > { %1263 = vst [vmem:[%s1965_s17] sm:$0xff] %v970_v37  ;;  %1265 = vst [vmem:[%s1965_s17 + $0x10] sm:$0xff] %v1011_v38  ;;  %v974_v62 = vpop.f32.mrb[35].mxu0  ;;  %v1015_v45 = vpop.f32.mrb[35].mxu1 }
 0x202   : > { %1264 = vst [vmem:[%s1965_s17 + $0x8] sm:$0xff] %v972_v41  ;;  %1266 = vst [vmem:[%s1965_s17 + $0x18] sm:$0xff] %v1013_v42 }
 0x20e   : > { %v1051_v46 = vpop.f32.mrb[36].mxu0  ;;  %v1092_v47 = vpop.f32.mrb[36].mxu1 }
 0x20f   : > { %v1052_v51 = vadd.f32 %v1051_v46, %v929_v14  ;;  %v1093_v52 = vadd.f32 %v1092_v47, %v929_v14  ;;  %v1053_v53 = vpop.f32.mrb[37].mxu0  ;;  %v1094_v54 = vpop.f32.mrb[37].mxu1 }
 0x210   : > { %v1054_v55 = vadd.f32 %v1053_v53, %v929_v14  ;;  %v1095_v56 = vadd.f32 %v1094_v54, %v929_v14  ;;  %v1055_v57 = vpop.f32.mrb[38].mxu0  ;;  %v1096_v58 = vpop.f32.mrb[38].mxu1 }
 0x211   : > { %1267 = vst [vmem:[%s1965_s17 + $0x20] sm:$0xff] %v1052_v51  ;;  %1269 = vst [vmem:[%s1965_s17 + $0x30] sm:$0xff] %v1093_v52  ;;  %v1056_v59 = vpop.f32.mrb[39].mxu0  ;;  %v1097_v60 = vpop.f32.mrb[39].mxu1 }
 0x212   : > { %1268 = vst [vmem:[%s1965_s17 + $0x28] sm:$0xff] %v1054_v55  ;;  %1270 = vst [vmem:[%s1965_s17 + $0x38] sm:$0xff] %v1095_v56 }
 0x21e   : > { %v1133_v61 = vpop.f32.mrb[40].mxu0  ;;  %v1174_v63 = vpop.f32.mrb[40].mxu1 }
 0x21f   : > { %v1134_v48 = vadd.f32 %v1133_v61, %v929_v14  ;;  %v1175_v1 = vadd.f32 %v1174_v63, %v929_v14  ;;  %v1135_v2 = vpop.f32.mrb[41].mxu0  ;;  %v1176_v3 = vpop.f32.mrb[41].mxu1 }
 0x220   : > { %v1136_v4 = vadd.f32 %v1135_v2, %v929_v14  ;;  %v1177_v5 = vadd.f32 %v1176_v3, %v929_v14  ;;  %v1137_v6 = vpop.f32.mrb[42].mxu0  ;;  %v1178_v49 = vpop.f32.mrb[42].mxu1 }
 0x221   : > { %1271 = vst [vmem:[%s1965_s17 + $0x40] sm:$0xff] %v1134_v48  ;;  %1273 = vst [vmem:[%s1965_s17 + $0x50] sm:$0xff] %v1175_v1  ;;  %v1138_v7 = vpop.f32.mrb[43].mxu0  ;;  %v1179_v8 = vpop.f32.mrb[43].mxu1 }
 0x222   : > { %1272 = vst [vmem:[%s1965_s17 + $0x48] sm:$0xff] %v1136_v4  ;;  %1274 = vst [vmem:[%s1965_s17 + $0x58] sm:$0xff] %v1177_v5 }
 0x22e   : > { %v1215_v9 = vpop.f32.mrb[44].mxu0  ;;  %v1256_v10 = vpop.f32.mrb[44].mxu1 }
 0x22f   : > { %v1216_v11 = vadd.f32 %v1215_v9, %v929_v14  ;;  %v1257_v12 = vadd.f32 %v1256_v10, %v929_v14  ;;  %v1217_v13 = vpop.f32.mrb[45].mxu0  ;;  %v1258_v15 = vpop.f32.mrb[45].mxu1 }
 0x230   : > { %v1218_v16 = vadd.f32 %v1217_v13, %v929_v14  ;;  %v1259_v17 = vadd.f32 %v1258_v15, %v929_v14  ;;  %v1219_v18 = vpop.f32.mrb[46].mxu0  ;;  %v1260_v0 = vpop.f32.mrb[46].mxu1 }
 0x231   : > { %1275 = vst [vmem:[%s1965_s17 + $0x60] sm:$0xff] %v1216_v11  ;;  %1277 = vst [vmem:[%s1965_s17 + $0x70] sm:$0xff] %v1257_v12  ;;  %v1220_v19 = vpop.f32.mrb[47].mxu0  ;;  %v1261_v20 = vpop.f32.mrb[47].mxu1 }
 0x232   : > { %1276 = vst [vmem:[%s1965_s17 + $0x68] sm:$0xff] %v1218_v16  ;;  %1278 = vst [vmem:[%s1965_s17 + $0x78] sm:$0xff] %v1259_v17 }
 0x233   : > { %1549 = shalt.err (!%p1546_p6)
}
 0x234   : > { %s1550_s25 = scalar_lea.hbm %s1984_s12, 2048  ;;  %s1554_s14 = scalar_lea.hbm %s2042_s5, 4096 }
 0x235   : > { %p1551_p4 = scmp.ne.s32.totalorder %s1984_s12, %s1550_s25  ;;  %p1555_p1 = scmp.lt.u32.totalorder %s1984_s12, %s2042_s5 }
 0x236   : > { %p1556_p2 = scmp.lt.u32.totalorder %s1554_s14, %s1550_s25  ;;  %p1558_p8 = scmp.lt.u32.totalorder %s1550_s25, %s1984_s12 }
 0x237   : > { %p1552_p10 = pnand %p1551_p4, %p2051_p9 }
 0x238   : > { %p1557_p5 = por %p1556_p2, %p1555_p1 }
 0x239   : > { %p1553_p12 = pneg %p1552_p10 }
 0x23a   : > { %p1559_p11 = por %p1558_p8, %p1557_p5 }
 0x23c   : > { %p1560_p0 = pnand %p1559_p11, %p1553_p12 }
 0x23e   : > { %1563 = shalt.err (!%p1560_p0)
}
 0x23f   : > { %1433 = dma.vmem_to_hbm [thread:$0]  (%p2051_p9), %s1986_s10, 2048, %s1984_s12, %s1280_s21  }
 0x240 PF: > { %s1308_s24 = sand.u32 1, %s1598_s18   ;;  %p2052_p7 = scmp.ne.s32.totalorder %s2047_s8, 0 }
 0x241   : > { %p2053_p13 = scmp.ge.s32.totalorder %s1618_s23, 2  ;;  %s1309_s11 = scalar_lea.sflag [#allocation4], %s1308_s24 }
 0x243   : > { %p1440_p3 = pnand %p2053_p13, %p2052_p7 }
 0x245   : > { %1593 = dma.done.wait (!%p1440_p3), %s1309_s11, 2048  }
 0x246   : > { %1595 = vsyncadd (!%p1440_p3), %s1309_s11, 4294965248  ;;  %s21_s23 = sadd.s32 1, %s1618_s23   ;;  %s2054_s18 = smov %s1602_s19 }
 0x247   : > { %p18_p6 = scmp.ge.s32.totalorder %s21_s23, 4   ;;  %s2055_s19 = smov %s1606_s20 }
 0x248   : > { %s2056_s20 = smov %s1709_s7  ;;  %s2057_s21 = smov %s1614_s22 }
 0x249   : > { %s2058_s22 = smov %s2060_s26  ;;  %20 = sbr.rel (!%p18_p6) target bundleno = 6 (0x6), region = 85 }
 0x250   :  { %1314 = vsyncpa [#allocation3], 1 }
 0x251   :  { %1316 = vsyncpa [#allocation3 + $0x1], 1 }
 0x252   :  { %1317 = vsyncpa [#allocation4], 1 }
 0x253   :  { %1319 = vsyncpa [#allocation4 + $0x1], 1 }

</bundles_post_ra>
